<compile_context>
chip_gen: v7x
topology: tpu7x:2x2x1
jax: 0.10.0
libtpu: 0.0.40
codegen_flags: <defaults>
</compile_context>

<pallas_src>
import math

import jax
import jax.numpy as jnp
from jax.experimental import pallas as pl
from jax.experimental.pallas import tpu as pltpu


def _round_up(n, m):
    return ((n + m - 1) // m) * m


# ---------------------------------------------------------------------------
# Pallas kernel: the whole 4-matmul hot path for one M-tile of the batch.
# All weights fit in VMEM and stay resident across grid iterations.
# ---------------------------------------------------------------------------
def mlp_kernel(x_ref,
               w1_ref, b1_ref,
               w2_ref, b2_ref,
               w3_ref, b3_ref,
               w4_ref, b4_ref,
               o_ref):
    # bf16 inputs to the MXU, f32 accumulation, f32 bias adds.
    h = jnp.dot(x_ref[...], w1_ref[...],
                preferred_element_type=jnp.float32) + b1_ref[...]
    h = jnp.dot(h.astype(jnp.bfloat16), w2_ref[...],
                preferred_element_type=jnp.float32) + b2_ref[...]
    h = jnp.dot(h.astype(jnp.bfloat16), w3_ref[...],
                preferred_element_type=jnp.float32) + b3_ref[...]
    o = jnp.dot(h.astype(jnp.bfloat16), w4_ref[...],
                preferred_element_type=jnp.float32) + b4_ref[...]
    o_ref[...] = o  # lane-dense (multiple-of-128) f32 store


# ---------------------------------------------------------------------------
# Wrapper: pad batch + feature dims, run a 1-D "parallel" grid over M-tiles,
# slice the logical logits back out.
# ---------------------------------------------------------------------------
def mymlp_forward(x_nchw, packed_params, num_class):
    """x_nchw: (B, 1, H, W) float32. Returns logits (B, num_class) float32."""
    (w1, b1), (w2, b2), (w3, b3), (w4, b4) = packed_params
    B = x_nchw.shape[0]
    in_dim = x_nchw.shape[1] * x_nchw.shape[2] * x_nchw.shape[3]
    x2d = jnp.reshape(x_nchw, (B, in_dim))

    Kp = w1.shape[0]               # padded input features (multiple of 128)
    Np = w4.shape[1]               # padded output classes  (multiple of 128)
    tm = min(128, _round_up(B, 8))  # adaptive M-tile (sublane-aligned)
    Bp = _round_up(B, tm)

    # Zero-padded batch rows only ever see the bias; zero-padded feature
    # columns hit zero weight rows -> semantics are exact after slicing.
    x2d = jnp.pad(x2d, ((0, Bp - B), (0, Kp - in_dim))).astype(jnp.bfloat16)

    grid = (Bp // tm,)
    resident = lambda i: (0, 0)  # weights/biases pinned to block 0 across M-tiles

    flops = 2 * Bp * (Kp * w1.shape[1] + w2.shape[0] * w2.shape[1]
                      + w3.shape[0] * w3.shape[1] + w4.shape[0] * Np)
    bytes_accessed = (x2d.size * 2 + Bp * Np * 4
                      + sum(w.size * 2 + b.size * 4 for w, b in packed_params))

    out = pl.pallas_call(
        mlp_kernel,
        out_shape=jax.ShapeDtypeStruct((Bp, Np), jnp.float32),
        grid=grid,
        in_specs=[
            pl.BlockSpec((tm, Kp), lambda i: (i, 0)),
            pl.BlockSpec(w1.shape, resident), pl.BlockSpec(b1.shape, resident),
            pl.BlockSpec(w2.shape, resident), pl.BlockSpec(b2.shape, resident),
            pl.BlockSpec(w3.shape, resident), pl.BlockSpec(b3.shape, resident),
            pl.BlockSpec(w4.shape, resident), pl.BlockSpec(b4.shape, resident),
        ],
        out_specs=pl.BlockSpec((tm, Np), lambda i: (i, 0)),
        compiler_params=pltpu.CompilerParams(
            dimension_semantics=("parallel",)),
        cost_estimate=pl.CostEstimate(flops=flops, transcendentals=0,
                                      bytes_accessed=bytes_accessed),
    )(x2d, w1, b1, w2, b2, w3, b3, w4, b4)

    return out[:B, :num_class]


# ---------------------------------------------------------------------------
# Parameter init (mimics torch.nn.Linear default: U(-k, k), k = 1/sqrt(fan_in)),
# logical f32 shapes; packing pads to multiples of 128 and casts weights bf16.
# ---------------------------------------------------------------------------
def init_params(key, image_size, hidden_size, num_class):
    dims = [(image_size * image_size, hidden_size),
            (hidden_size, hidden_size),
            (hidden_size, hidden_size),
            (hidden_size, num_class)]
    params = []
    for fan_in, fan_out in dims:
        key, kw, kb = jax.random.split(key, 3)
        bound = 1.0 / math.sqrt(fan_in)
        w = jax.random.uniform(kw, (fan_in, fan_out), jnp.float32, -bound, bound)
        b = jax.random.uniform(kb, (1, fan_out), jnp.float32, -bound, bound)
        params.append((w, b))
    return params


def pack_params(params):
    """Zero-pad every dim to a multiple of 128; weights -> bf16, biases -> f32.

    Zero padding keeps the math exact (padded activation columns stay zero and
    feed zero weight rows); the wrapper slices logical columns back out.
    """
    packed = []
    for w, b in params:
        fi, fo = w.shape
        fip, fop = _round_up(fi, 128), _round_up(fo, 128)
        wp = jnp.pad(w, ((0, fip - fi), (0, fop - fo))).astype(jnp.bfloat16)
        bp = jnp.pad(b, ((0, 0), (0, fop - fo))).astype(jnp.float32)
        packed.append((wp, bp))
    return packed


if __name__ == "__main__":
    # Small shapes consistent with the module (image_size fixed at 28 by the
    # reshape semantics; hidden / batch scaled down from 500 / 100).
    batch = 8
    image_size = 28
    hidden_size = 128
    num_class = 10

    key = jax.random.PRNGKey(0)
    key, kx = jax.random.split(key)
    x = jax.random.normal(kx, (batch, 1, image_size, image_size), jnp.float32)

    params = init_params(key, image_size, hidden_size, num_class)
    packed = pack_params(params)

    out = mymlp_forward(x, packed, num_class)
    out = jax.block_until_ready(out)

    # Pure-JAX reference emulating the kernel's bf16-operand / f32-accumulate
    # numerics (inputs & weights quantized to bf16, bias adds in f32).
    ref = jnp.reshape(x, (batch, -1)).astype(jnp.bfloat16).astype(jnp.float32)
    for li, (w, b) in enumerate(params):
        ref = ref @ w.astype(jnp.bfloat16).astype(jnp.float32) + b
        if li < len(params) - 1:
            ref = ref.astype(jnp.bfloat16).astype(jnp.float32)

    assert out.shape == (batch, num_class)
    assert jnp.allclose(out, ref, atol=2e-2, rtol=2e-2), \
        float(jnp.max(jnp.abs(out - ref)))

    print("KERNEL_OK")
</pallas_src>

<mosaic_0001>
module attributes {stable_mosaic.version = 11 : i64} {
  func.func @mlp_kernel(%arg0: i32, %arg1: memref<8x896xbf16, #tpu.memory_space<vmem>>, %arg2: memref<896x128xbf16, #tpu.memory_space<vmem>>, %arg3: memref<1x128xf32, #tpu.memory_space<vmem>>, %arg4: memref<128x128xbf16, #tpu.memory_space<vmem>>, %arg5: memref<1x128xf32, #tpu.memory_space<vmem>>, %arg6: memref<128x128xbf16, #tpu.memory_space<vmem>>, %arg7: memref<1x128xf32, #tpu.memory_space<vmem>>, %arg8: memref<128x128xbf16, #tpu.memory_space<vmem>>, %arg9: memref<1x128xf32, #tpu.memory_space<vmem>>, %arg10: memref<8x128xf32, #tpu.memory_space<vmem>>) attributes {dimension_semantics = [#tpu.dimension_semantics<parallel>], iteration_bounds = array<i64: 1>, scalar_prefetch = 0 : i64, scratch_operands = 0 : i64, tpu.core_type = #tpu.core_type<tc>, window_params = [{transform_indices = @transform_0, window_bounds = array<i64: 8, 896>}, {pipeline_mode = #tpu.pipeline_mode<synchronous>, transform_indices = @transform_1, window_bounds = array<i64: 896, 128>}, {pipeline_mode = #tpu.pipeline_mode<synchronous>, transform_indices = @transform_2, window_bounds = array<i64: 1, 128>}, {pipeline_mode = #tpu.pipeline_mode<synchronous>, transform_indices = @transform_3, window_bounds = array<i64: 128, 128>}, {pipeline_mode = #tpu.pipeline_mode<synchronous>, transform_indices = @transform_4, window_bounds = array<i64: 1, 128>}, {pipeline_mode = #tpu.pipeline_mode<synchronous>, transform_indices = @transform_5, window_bounds = array<i64: 128, 128>}, {pipeline_mode = #tpu.pipeline_mode<synchronous>, transform_indices = @transform_6, window_bounds = array<i64: 1, 128>}, {pipeline_mode = #tpu.pipeline_mode<synchronous>, transform_indices = @transform_7, window_bounds = array<i64: 128, 128>}, {pipeline_mode = #tpu.pipeline_mode<synchronous>, transform_indices = @transform_8, window_bounds = array<i64: 1, 128>}, {transform_indices = @transform_9, window_bounds = array<i64: 8, 128>}]} {
    %c0 = arith.constant 0 : index
    %c0_0 = arith.constant 0 : index
    %0 = vector.load %arg1[%c0, %c0_0] : memref<8x896xbf16, #tpu.memory_space<vmem>>, vector<8x896xbf16>
    %c0_1 = arith.constant 0 : index
    %c0_2 = arith.constant 0 : index
    %1 = vector.load %arg2[%c0_1, %c0_2] : memref<896x128xbf16, #tpu.memory_space<vmem>>, vector<896x128xbf16>
    %cst = arith.constant dense<0.000000e+00> : vector<8x128xf32>
    %2 = tpu.matmul %0, %1, %cst {dimension_numbers = #tpu.dot_dimension_numbers<[1], [0], [0], [1], [0, 0, 1, 1], [], []>} : vector<8x896xbf16>, vector<896x128xbf16>, vector<8x128xf32> -> vector<8x128xf32>
    %c0_3 = arith.constant 0 : index
    %c0_4 = arith.constant 0 : index
    %3 = vector.load %arg3[%c0_3, %c0_4] : memref<1x128xf32, #tpu.memory_space<vmem>>, vector<1x128xf32>
    %4 = vector.broadcast %3 : vector<1x128xf32> to vector<8x128xf32>
    %5 = arith.addf %2, %4 : vector<8x128xf32>
    %6 = arith.truncf %5 : vector<8x128xf32> to vector<8x128xbf16>
    %c0_5 = arith.constant 0 : index
    %c0_6 = arith.constant 0 : index
    %7 = vector.load %arg4[%c0_5, %c0_6] : memref<128x128xbf16, #tpu.memory_space<vmem>>, vector<128x128xbf16>
    %cst_7 = arith.constant dense<0.000000e+00> : vector<8x128xf32>
    %8 = tpu.matmul %6, %7, %cst_7 {dimension_numbers = #tpu.dot_dimension_numbers<[1], [0], [0], [1], [0, 0, 1, 1], [], []>} : vector<8x128xbf16>, vector<128x128xbf16>, vector<8x128xf32> -> vector<8x128xf32>
    %c0_8 = arith.constant 0 : index
    %c0_9 = arith.constant 0 : index
    %9 = vector.load %arg5[%c0_8, %c0_9] : memref<1x128xf32, #tpu.memory_space<vmem>>, vector<1x128xf32>
    %10 = vector.broadcast %9 : vector<1x128xf32> to vector<8x128xf32>
    %11 = arith.addf %8, %10 : vector<8x128xf32>
    %12 = arith.truncf %11 : vector<8x128xf32> to vector<8x128xbf16>
    %c0_10 = arith.constant 0 : index
    %c0_11 = arith.constant 0 : index
    %13 = vector.load %arg6[%c0_10, %c0_11] : memref<128x128xbf16, #tpu.memory_space<vmem>>, vector<128x128xbf16>
    %cst_12 = arith.constant dense<0.000000e+00> : vector<8x128xf32>
    %14 = tpu.matmul %12, %13, %cst_12 {dimension_numbers = #tpu.dot_dimension_numbers<[1], [0], [0], [1], [0, 0, 1, 1], [], []>} : vector<8x128xbf16>, vector<128x128xbf16>, vector<8x128xf32> -> vector<8x128xf32>
    %c0_13 = arith.constant 0 : index
    %c0_14 = arith.constant 0 : index
    %15 = vector.load %arg7[%c0_13, %c0_14] : memref<1x128xf32, #tpu.memory_space<vmem>>, vector<1x128xf32>
    %16 = vector.broadcast %15 : vector<1x128xf32> to vector<8x128xf32>
    %17 = arith.addf %14, %16 : vector<8x128xf32>
    %18 = arith.truncf %17 : vector<8x128xf32> to vector<8x128xbf16>
    %c0_15 = arith.constant 0 : index
    %c0_16 = arith.constant 0 : index
    %19 = vector.load %arg8[%c0_15, %c0_16] : memref<128x128xbf16, #tpu.memory_space<vmem>>, vector<128x128xbf16>
    %cst_17 = arith.constant dense<0.000000e+00> : vector<8x128xf32>
    %20 = tpu.matmul %18, %19, %cst_17 {dimension_numbers = #tpu.dot_dimension_numbers<[1], [0], [0], [1], [0, 0, 1, 1], [], []>} : vector<8x128xbf16>, vector<128x128xbf16>, vector<8x128xf32> -> vector<8x128xf32>
    %c0_18 = arith.constant 0 : index
    %c0_19 = arith.constant 0 : index
    %21 = vector.load %arg9[%c0_18, %c0_19] : memref<1x128xf32, #tpu.memory_space<vmem>>, vector<1x128xf32>
    %22 = vector.broadcast %21 : vector<1x128xf32> to vector<8x128xf32>
    %23 = arith.addf %20, %22 : vector<8x128xf32>
    %c0_20 = arith.constant 0 : index
    %c0_21 = arith.constant 0 : index
    %24 = vector.load %arg10[%c0_20, %c0_21] : memref<8x128xf32, #tpu.memory_space<vmem>>, vector<8x128xf32>
    tpu.vector_store %arg10[%c0_20, %c0_21], %23 {strides = array<i32>} : memref<8x128xf32, #tpu.memory_space<vmem>>, vector<8x128xf32>,
    return
  }
  func.func @transform_0(%arg0: i32) -> (i32, i32) {
    %c0_i32 = arith.constant 0 : i32
    %c0_i32_0 = arith.constant 0 : i32
    return %arg0, %c0_i32 : i32, i32
  }
  func.func @transform_1(%arg0: i32) -> (i32, i32) {
    %c0_i32 = arith.constant 0 : i32
    %c0_i32_0 = arith.constant 0 : i32
    %c0_i32_1 = arith.constant 0 : i32
    return %c0_i32, %c0_i32_0 : i32, i32
  }
  func.func @transform_2(%arg0: i32) -> (i32, i32) {
    %c0_i32 = arith.constant 0 : i32
    %c0_i32_0 = arith.constant 0 : i32
    %c0_i32_1 = arith.constant 0 : i32
    return %c0_i32, %c0_i32_0 : i32, i32
  }
  func.func @transform_3(%arg0: i32) -> (i32, i32) {
    %c0_i32 = arith.constant 0 : i32
    %c0_i32_0 = arith.constant 0 : i32
    %c0_i32_1 = arith.constant 0 : i32
    return %c0_i32, %c0_i32_0 : i32, i32
  }
  func.func @transform_4(%arg0: i32) -> (i32, i32) {
    %c0_i32 = arith.constant 0 : i32
    %c0_i32_0 = arith.constant 0 : i32
    %c0_i32_1 = arith.constant 0 : i32
    return %c0_i32, %c0_i32_0 : i32, i32
  }
  func.func @transform_5(%arg0: i32) -> (i32, i32) {
    %c0_i32 = arith.constant 0 : i32
    %c0_i32_0 = arith.constant 0 : i32
    %c0_i32_1 = arith.constant 0 : i32
    return %c0_i32, %c0_i32_0 : i32, i32
  }
  func.func @transform_6(%arg0: i32) -> (i32, i32) {
    %c0_i32 = arith.constant 0 : i32
    %c0_i32_0 = arith.constant 0 : i32
    %c0_i32_1 = arith.constant 0 : i32
    return %c0_i32, %c0_i32_0 : i32, i32
  }
  func.func @transform_7(%arg0: i32) -> (i32, i32) {
    %c0_i32 = arith.constant 0 : i32
    %c0_i32_0 = arith.constant 0 : i32
    %c0_i32_1 = arith.constant 0 : i32
    return %c0_i32, %c0_i32_0 : i32, i32
  }
  func.func @transform_8(%arg0: i32) -> (i32, i32) {
    %c0_i32 = arith.constant 0 : i32
    %c0_i32_0 = arith.constant 0 : i32
    %c0_i32_1 = arith.constant 0 : i32
    return %c0_i32, %c0_i32_0 : i32, i32
  }
  func.func @transform_9(%arg0: i32) -> (i32, i32) {
    %c0_i32 = arith.constant 0 : i32
    %c0_i32_0 = arith.constant 0 : i32
    return %arg0, %c0_i32 : i32, i32
  }
}

</mosaic_0001>

<bundles_post_ra>
// kernel: tpu_custom_call.1
= control target key start
LH: loop header
LB: loop body
LE: loop exit
PB: predicated region body
PF: predicated region fallthrough
CT: control target
= control target key end

     0   :  { %14 = vsyncpa [#allocation3], 0  ;;  %s1804_s0 = inlined_call_operand.hbm [shape: bf16[8,896], index: 0, kind: input, shape index: {}]   ;;  %s1805_s1 = inlined_call_operand.hbm [shape: bf16[896,128], index: 1, kind: input, shape index: {}]   ;;  %s1806_s2 = inlined_call_operand.vmem [shape: f32[1,128], index: 2, kind: input, shape index: {}]   ;;  %s1807_s3 = inlined_call_operand.hbm [shape: bf16[128,128], index: 3, kind: input, shape index: {}]   ;;  %s1808_s4 = inlined_call_operand.vmem [shape: f32[1,128], index: 4, kind: input, shape index: {}]   ;;  %s1809_s5 = inlined_call_operand.hbm [shape: bf16[128,128], index: 5, kind: input, shape index: {}]   ;;  %s1810_s6 = inlined_call_operand.vmem [shape: f32[1,128], index: 6, kind: input, shape index: {}]   ;;  %s1811_s7 = inlined_call_operand.hbm [shape: bf16[128,128], index: 7, kind: input, shape index: {}]   ;;  %s1812_s8 = inlined_call_operand.vmem [shape: f32[1,128], index: 8, kind: input, shape index: {}]   ;;  %s1813_s9 = inlined_call_operand.hbm [shape: f32[8,128], index: 9, kind: output, shape index: {}]  }
   0x1   :  { %15 = vsyncpa [#allocation6], 0 }
   0x2   :  { %16 = vsyncpa [#allocation9], 0 }
   0x3   :  { %17 = vsyncpa [#allocation4], 0  ;;  %s1608_s30 = smov [#allocation5]   ;;  %s1468_s13 = scalar_lea.hbm %s1805_s1, 7168 }
   0x4   :  { %s33_s10 = sshll.u32 %s1608_s30, 4  ;;  %p1469_p0 = scmp.ne.s32.totalorder %s1805_s1, %s1468_s13  ;;  %s34_s10 = int_to_ptr.vmem [resolvable:$true] %s33_s10 }
   0x5   :  { %p1472_p1 = scmp.lt.u32.totalorder %s1468_s13, %s1805_s1 }
   0x7   :  { %p1474_p2 = pnand %p1472_p1, %p1469_p0 }
   0x9   :  { %1477 = shalt.err (!%p1474_p2)
}
   0xa   :  { %s1478_s18 = scalar_lea.vmem %s34_s10, 7168  ;;  %p1483_p4 = scmp.lt.s32.totalorder %s34_s10, %s34_s10 }
   0xb   :  { %p1479_p3 = scmp.ne.s32.totalorder %s34_s10, %s1478_s18  ;;  %p1484_p5 = scmp.lt.s32.totalorder %s1478_s18, %s1478_s18 }
   0xd   :  { %p1485_p6 = por %p1484_p5, %p1483_p4 }
   0xf   :  { %p1486_p7 = pnand %p1485_p6, %p1479_p3 }
  0x11   :  { %1489 = shalt.err (!%p1486_p7)
}
  0x12   :  { %s1609_s19 = smov 64   ;;  %s1610_s20 = smov 4  }
  0x13   :  { %39 = dma.hbm_to_vmem [thread:$0]  %s1805_s1, 7168, %s34_s10, [#allocation6], %s1609_s19, %s1609_s19, %s1610_s20  }
  0x14   :  { %s1611_s23 = smov [#allocation8]   ;;  %s1612_s25 = smov [#allocation2]  }
  0x15   :  { %s61_s24 = sshll.u32 %s1611_s23, 4  ;;  %s24_s26 = sshll.u32 %s1612_s25, 4  ;;  %s62_s24 = int_to_ptr.vmem [resolvable:$true] %s61_s24  ;;  %s25_s26 = int_to_ptr.vmem [resolvable:$true] %s24_s26 }
  0x16   :  { %s1490_s29 = scalar_lea.hbm %s1809_s5, 1024 }
  0x17   :  { %p1491_p8 = scmp.ne.s32.totalorder %s1809_s5, %s1490_s29  ;;  %p1494_p9 = scmp.lt.u32.totalorder %s1490_s29, %s1809_s5 }
  0x19   :  { %p1496_p10 = pnand %p1494_p9, %p1491_p8 }
  0x1b   :  { %1499 = shalt.err (!%p1496_p10)
}
  0x1c   :  { %s1500_s1 = scalar_lea.vmem %s62_s24, 1024  ;;  %p1505_p12 = scmp.lt.s32.totalorder %s62_s24, %s62_s24 }
  0x1d   :  { %p1501_p11 = scmp.ne.s32.totalorder %s62_s24, %s1500_s1  ;;  %p1506_p13 = scmp.lt.s32.totalorder %s1500_s1, %s1500_s1 }
  0x1f   :  { %p1507_p0 = por %p1506_p13, %p1505_p12 }
  0x21   :  { %p1508_p1 = pnand %p1507_p0, %p1501_p11 }
  0x23   :  { %1511 = shalt.err (!%p1508_p1)
}
  0x24   :  { %67 = dma.hbm_to_vmem [thread:$0]  %s1809_s5, 1024, %s62_s24, [#allocation9], %s1609_s19, %s1609_s19, %s1610_s20  }
  0x25   :  { %s1512_s17 = scalar_lea.hbm %s1804_s0, 448 }
  0x26   :  { %p1513_p2 = scmp.ne.s32.totalorder %s1804_s0, %s1512_s17  ;;  %p1516_p3 = scmp.lt.u32.totalorder %s1512_s17, %s1804_s0 }
  0x28   :  { %p1518_p4 = pnand %p1516_p3, %p1513_p2 }
  0x2a   :  { %1521 = shalt.err (!%p1518_p4)
}
  0x2b   :  { %s1522_s25 = scalar_lea.vmem %s25_s26, 448  ;;  %p1527_p6 = scmp.lt.s32.totalorder %s25_s26, %s25_s26 }
  0x2c   :  { %p1523_p5 = scmp.ne.s32.totalorder %s25_s26, %s1522_s25  ;;  %p1528_p7 = scmp.lt.s32.totalorder %s1522_s25, %s1522_s25 }
  0x2e   :  { %p1529_p8 = por %p1528_p7, %p1527_p6 }
  0x30   :  { %p1530_p9 = pnand %p1529_p8, %p1523_p5 }
  0x32   :  { %1533 = shalt.err (!%p1530_p9)
}
  0x33   :  { %27 = dma.hbm_to_vmem [thread:$0]  %s1804_s0, 448, %s25_s26, [#allocation3]  }
  0x34   :  { %s1613_s27 = smov [#allocation7]   ;;  %s1614_s29 = smov [#allocation10]  }
  0x35   :  { %s47_s28 = sshll.u32 %s1613_s27, 4  ;;  %s75_s30 = sshll.u32 %s1614_s29, 4  ;;  %s48_s28 = int_to_ptr.vmem [resolvable:$true] %s47_s28  ;;  %s76_s30 = int_to_ptr.vmem [resolvable:$true] %s75_s30 }
  0x36   :  { %s1534_s13 = scalar_lea.hbm %s1807_s3, 1024 }
  0x37   :  { %p1535_p10 = scmp.ne.s32.totalorder %s1807_s3, %s1534_s13  ;;  %p1538_p11 = scmp.lt.u32.totalorder %s1534_s13, %s1807_s3 }
  0x39   :  { %p1540_p12 = pnand %p1538_p11, %p1535_p10 }
  0x3b   :  { %1543 = shalt.err (!%p1540_p12)
}
  0x3c   :  { %s1544_s0 = scalar_lea.vmem %s48_s28, 1024  ;;  %p1549_p0 = scmp.lt.s32.totalorder %s48_s28, %s48_s28 }
  0x3d   :  { %p1545_p13 = scmp.ne.s32.totalorder %s48_s28, %s1544_s0  ;;  %p1550_p1 = scmp.lt.s32.totalorder %s1544_s0, %s1544_s0 }
  0x3f   :  { %p1551_p2 = por %p1550_p1, %p1549_p0 }
  0x41   :  { %p1552_p3 = pnand %p1551_p2, %p1545_p13 }
  0x43   :  { %1555 = shalt.err (!%p1552_p3)
}
  0x44   :  { %53 = dma.hbm_to_vmem [thread:$0]  %s1807_s3, 1024, %s48_s28, [#allocation6], %s1609_s19, %s1609_s19, %s1610_s20  }
  0x45   :  { %s1556_s21 = scalar_lea.hbm %s1811_s7, 1024 }
  0x46   :  { %p1557_p4 = scmp.ne.s32.totalorder %s1811_s7, %s1556_s21  ;;  %p1560_p5 = scmp.lt.u32.totalorder %s1556_s21, %s1811_s7 }
  0x48   :  { %p1562_p6 = pnand %p1560_p5, %p1557_p4 }
  0x4a   :  { %1565 = shalt.err (!%p1562_p6)
}
  0x4b   :  { %s1566_s24 = scalar_lea.vmem %s76_s30, 1024  ;;  %p1571_p8 = scmp.lt.s32.totalorder %s76_s30, %s76_s30 }
  0x4c   :  { %p1567_p7 = scmp.ne.s32.totalorder %s76_s30, %s1566_s24  ;;  %p1572_p9 = scmp.lt.s32.totalorder %s1566_s24, %s1566_s24 }
  0x4e   :  { %p1573_p10 = por %p1572_p9, %p1571_p8 }
  0x50   :  { %p1574_p11 = pnand %p1573_p10, %p1567_p7 }
  0x52   :  { %1577 = shalt.err (!%p1574_p11)
}
  0x53   :  { %81 = dma.hbm_to_vmem [thread:$0]  %s1811_s7, 1024, %s76_s30, [#allocation9], %s1609_s19, %s1609_s19, %s1610_s20  }
  0x54   :  { %1600 = dma.done.wait [#allocation3], 448  }
  0x55   :  { %1601 = vsyncadd [#allocation3], 4294966848 }
  0x56   :  { %1602 = dma.done.wait [#allocation6], 8192  }
  0x57   :  { %1603 = vsyncadd [#allocation6], 4294959104 }
  0x58   :  { %1604 = dma.done.wait [#allocation9], 2048  }
  0x59   :  { %1605 = vsyncadd [#allocation9], 4294965248  ;;  %v1381_v0 = vld [vmem:[#allocation5 + $0x40] sm:$0xff]   ;;  %v1385_v4 = vld [vmem:[#allocation5 + $0x48] sm:$0xff]   ;;  %v1615_v42 = vmov 0.0   ;;  %vm1616_vm0 = vmmov 0  }
  0x5a   :  { %v1382_v1 = vld [vmem:[#allocation5] sm:$0xff]   ;;  %1189 = vmatprep.subr.bf16.mxu0 %v1381_v0  ;;  %v1386_v5 = vld [vmem:[#allocation5 + $0x8] sm:$0xff]   ;;  %v1389_v8 = vld [vmem:[#allocation5 + $0x50] sm:$0xff]   ;;  %s1617_s11 = smov [#allocation11]  }
  0x5b   :  { %v1383_v2 = vld [vmem:[#allocation5 + $0xc0] sm:$0xff]   ;;  %1190 = vmatpush3.bf16.msra.mxu0 %v1382_v1  ;;  %v1387_v6 = vld [vmem:[#allocation5 + $0xc8] sm:$0xff]   ;;  %v1390_v9 = vld [vmem:[#allocation5 + $0x10] sm:$0xff]   ;;  %s1087_s12 = sshll.u32 %s1617_s11, 4  ;;  %s1088_s12 = int_to_ptr.vmem [resolvable:$true] %s1087_s12 }
  0x5c   :  { %v1384_v3 = vld [vmem:[#allocation5 + $0x80] sm:$0xff]   ;;  %1211 = vmatprep.subr.bf16.mxu1 %v1383_v2  ;;  %1191 = vmatprep.subr.bf16.mxu0 %v1385_v4  ;;  %v1388_v7 = vld [vmem:[#allocation5 + $0x88] sm:$0xff]   ;;  %v1391_v10 = vld [vmem:[#allocation5 + $0xd0] sm:$0xff]   ;;  %p1583_p13 = scmp.lt.s32.totalorder %s1088_s12, %s1088_s12 }
  0x5d   :  { %1212 = vmatpush3.bf16.msra.mxu1 %v1384_v3  ;;  %v1392_v11 = vld [vmem:[#allocation5 + $0x90] sm:$0xff]   ;;  %v1393_v12 = vld [vmem:[#allocation5 + $0x58] sm:$0xff]   ;;  %v1397_v16 = vld [vmem:[#allocation5 + $0x60] sm:$0xff]  }
  0x5e   :  { %1213 = vmatprep.subr.bf16.mxu1 %v1387_v6  ;;  %v1394_v13 = vld [vmem:[#allocation5 + $0x18] sm:$0xff]   ;;  %v1398_v17 = vld [vmem:[#allocation5 + $0x20] sm:$0xff]   ;;  %v1401_v20 = vld [vmem:[#allocation5 + $0x68] sm:$0xff]  }
  0x5f   :  { %1192 = vmatpush3.bf16.msra.mxu0 %v1386_v5  ;;  %v1395_v14 = vld [vmem:[#allocation5 + $0xd8] sm:$0xff]   ;;  %v1399_v18 = vld [vmem:[#allocation5 + $0xe0] sm:$0xff]   ;;  %v1402_v21 = vld [vmem:[#allocation5 + $0x28] sm:$0xff]  }
  0x60   :  { %1193 = vmatprep.subr.bf16.mxu0 %v1389_v8  ;;  %v1396_v15 = vld [vmem:[#allocation5 + $0x98] sm:$0xff]   ;;  %v1400_v19 = vld [vmem:[#allocation5 + $0xa0] sm:$0xff]   ;;  %v1403_v22 = vld [vmem:[#allocation5 + $0xe8] sm:$0xff]  }
  0x61   :  { %1214 = vmatpush3.bf16.msra.mxu1 %v1388_v7  ;;  %v1404_v23 = vld [vmem:[#allocation5 + $0xa8] sm:$0xff]   ;;  %v1405_v24 = vld [vmem:[#allocation5 + $0x70] sm:$0xff]   ;;  %v1409_v28 = vld [vmem:[#allocation5 + $0x78] sm:$0xff]  }
  0x62   :  { %1215 = vmatprep.subr.bf16.mxu1 %v1391_v10  ;;  %v1406_v25 = vld [vmem:[#allocation5 + $0x30] sm:$0xff]   ;;  %v1410_v29 = vld [vmem:[#allocation5 + $0x38] sm:$0xff]   ;;  %v100_v31 = vld [vmem:[#allocation2] sm:$0xff] }
  0x63   :  { %1194 = vmatpush3.bf16.msra.mxu0 %v1390_v9  ;;  %v1407_v26 = vld [vmem:[#allocation5 + $0xf0] sm:$0xff]   ;;  %v1411_v30 = vld [vmem:[#allocation5 + $0xf8] sm:$0xff]   ;;  %v1099_v32 = vcombine.low %v100_v31, %v100_v31  ;;  %v1100_v33 = vcombine.high %v100_v31, %v100_v31  ;;  %v1415_v35 = vld [vmem:[#allocation5 + $0x140] sm:$0xff]  }
  0x64   :  { %1195 = vmatprep.subr.bf16.mxu0 %v1393_v12  ;;  %v1408_v27 = vld [vmem:[#allocation5 + $0xb0] sm:$0xff]   ;;  %v1414_v34 = vld [vmem:[#allocation5 + $0xb8] sm:$0xff]   ;;  %v1418_v39 = vld [vmem:[#allocation5 + $0x100] sm:$0xff]  }
  0x65   :  { %1216 = vmatpush3.bf16.msra.mxu1 %v1392_v11  ;;  %v101_v36 = vld [vmem:[#allocation2 + $0x8] sm:$0xff]  ;;  %616 = vmatprep.mubr.bf16.mxu0 %v1100_v33  ;;  %v1419_v40 = vld [vmem:[#allocation5 + $0x180] sm:$0xff]   ;;  %v1426_v48 = vld [vmem:[#allocation5 + $0x158] sm:$0xff]  }
  0x66   :  { %1217 = vmatprep.subr.bf16.mxu1 %v1395_v14  ;;  %v1101_v37 = vcombine.low %v101_v36, %v101_v36  ;;  %v1102_v38 = vcombine.high %v101_v36, %v101_v36  ;;  %v1420_v41 = vld [vmem:[#allocation5 + $0x148] sm:$0xff]   ;;  %v1423_v45 = vld [vmem:[#allocation5 + $0x150] sm:$0xff]   ;;  %v1427_v49 = vld [vmem:[#allocation5 + $0x118] sm:$0xff]  }
  0x67   :  { %1196 = vmatpush3.bf16.msra.mxu0 %v1394_v13  ;;  %v1421_v43 = vld [vmem:[#allocation5 + $0x108] sm:$0xff]   ;;  %v1424_v46 = vld [vmem:[#allocation5 + $0x110] sm:$0xff]   ;;  %v1429_v50 = vld [vmem:[#allocation5 + $0x160] sm:$0xff]  }
  0x68   :  { %1197 = vmatprep.subr.bf16.mxu0 %v1397_v16  ;;  %656 = vmatprep.mubr.bf16.mxu1 %v1102_v38  ;;  %v1422_v44 = vld [vmem:[#allocation5 + $0x188] sm:$0xff]   ;;  %v1425_v47 = vld [vmem:[#allocation5 + $0x190] sm:$0xff]   ;;  %v1428_v51 = vld [vmem:[#allocation5 + $0x198] sm:$0xff]  }
  0x69   :  { %1218 = vmatpush3.bf16.msra.mxu1 %v1396_v15  ;;  %v1430_v52 = vld [vmem:[#allocation5 + $0x120] sm:$0xff]   ;;  %v1432_v53 = vld [vmem:[#allocation5 + $0x168] sm:$0xff]   ;;  %v1435_v56 = vld [vmem:[#allocation5 + $0x170] sm:$0xff]  }
  0x6a   :  { %1219 = vmatprep.subr.bf16.mxu1 %v1399_v18  ;;  %v1431_v54 = vld [vmem:[#allocation5 + $0x1a0] sm:$0xff]   ;;  %v1433_v55 = vld [vmem:[#allocation5 + $0x128] sm:$0xff]   ;;  %v1436_v58 = vld [vmem:[#allocation5 + $0x130] sm:$0xff]  }
  0x6b   :  { %1198 = vmatpush3.bf16.msra.mxu0 %v1398_v17  ;;  %v1434_v57 = vld [vmem:[#allocation5 + $0x1a8] sm:$0xff]   ;;  %v102_v59 = vld [vmem:[#allocation2 + $0x10] sm:$0xff]  ;;  %v1443_v2 = vld [vmem:[#allocation2 + $0x18] ss:$0 sps:$4 sm:$0xff]  }
  0x6c   :  { %1199 = vmatprep.subr.bf16.mxu0 %v1401_v20  ;;  %v1437_v60 = vld [vmem:[#allocation5 + $0x1b0] sm:$0xff]   ;;  %v1104_v61 = vcombine.high %v102_v59, %v102_v59  ;;  %v1438_v62 = vld [vmem:[#allocation5 + $0x178] sm:$0xff]   ;;  %v1103_v1 = vcombine.low %v102_v59, %v102_v59  ;;  %v1444_v3 = vld [vmem:[#allocation7] sm:$0xff]  }
  0x6d   :  { %1220 = vmatpush3.bf16.msra.mxu1 %v1400_v19  ;;  %v1439_v63 = vld [vmem:[#allocation5 + $0x138] sm:$0xff]   ;;  %v1445_v4 = vld [vmem:[#allocation7 + $0x8] sm:$0xff]   ;;  %v1446_v5 = vld [vmem:[#allocation7 + $0x10] sm:$0xff]  }
  0x6e   :  { %1221 = vmatprep.subr.bf16.mxu1 %v1403_v22  ;;  %v1442_v0 = vld [vmem:[#allocation5 + $0x1b8] sm:$0xff]   ;;  %v1448_v7 = vld [vmem:[#allocation7 + $0x20] sm:$0xff]   ;;  %v1449_v8 = vld [vmem:[#allocation7 + $0x28] sm:$0xff]  }
  0x6f   :  { %1200 = vmatpush3.bf16.msra.mxu0 %v1402_v21  ;;  %v1447_v6 = vld [vmem:[#allocation7 + $0x18] sm:$0xff]   ;;  %v1450_v9 = vld [vmem:[#allocation7 + $0x30] sm:$0xff]   ;;  %v1452_v11 = vld [vmem:[#allocation8] sm:$0xff]  }
  0x70   :  { %1201 = vmatprep.subr.bf16.mxu0 %v1405_v24  ;;  %v1451_v10 = vld [vmem:[#allocation7 + $0x38] sm:$0xff]   ;;  %v1453_v12 = vld [vmem:[#allocation8 + $0x8] sm:$0xff]   ;;  %v1454_v13 = vld [vmem:[#allocation8 + $0x10] sm:$0xff]  }
  0x71   :  { %1222 = vmatpush3.bf16.msra.mxu1 %v1404_v23  ;;  %v1455_v14 = vld [vmem:[#allocation8 + $0x18] sm:$0xff]   ;;  %v1456_v15 = vld [vmem:[#allocation8 + $0x20] sm:$0xff]   ;;  %v1457_v16 = vld [vmem:[#allocation8 + $0x28] sm:$0xff]  }
  0x72   :  { %1223 = vmatprep.subr.bf16.mxu1 %v1407_v26  ;;  %v1458_v17 = vld [vmem:[#allocation8 + $0x30] sm:$0xff]   ;;  %v1098_v19 = vld [vmem:[%s1806_s2] ss:$0 sm:$0xff]  ;;  %v1467_v59 = vld [vmem:[#allocation10 + $0x38] sm:$0xff]  }
  0x73   :  { %1202 = vmatpush3.bf16.msra.mxu0 %v1406_v25 }
  0x74   :  { %1203 = vmatprep.subr.bf16.mxu0 %v1409_v28 }
  0x75   :  { %1224 = vmatpush3.bf16.msra.mxu1 %v1408_v27 }
  0x76   :  { %1225 = vmatprep.subr.bf16.mxu1 %v1411_v30 }
  0x77   :  { %1204 = vmatpush3.bf16.msra.mxu0 %v1410_v29 }
  0x78   :  { %1233 = vmatprep.subr.bf16.mxu0 %v1415_v35 }
  0x79   :  { %1226 = vmatpush3.bf16.msra.mxu1 %v1414_v34 }
  0x7a   :  { %617 = vmatmul.mubr.bf16.vlgmr.msra.gmra.mrb[0].mxu0 %v1099_v32  ;;  %1291 = vmatprep.subr.bf16.mxu1 %v1615_v42 }
  0x7b   :  { %1234 = vmatpush3.bf16.msra.mxu0 %v1418_v39  ;;  %696 = vmatprep.mubr.bf16.mxu0 %v1104_v61 }
  0x7c   :  { %657 = vmatmul.mubr.bf16.vlgmr.msra.gmra.mrb[0].mxu1 %v1101_v37  ;;  %1235 = vmatprep.subr.bf16.mxu0 %v1420_v41 }
  0x7d   :  { %1292 = vmatpush3.bf16.msra.mxu1 %v1419_v40  ;;  %1307 = vmatprep.mubr.msk.bf16.mxu1 %vm1616_vm0, %v1615_v42 }
  0x7e   :  { %1293 = vmatprep.subr.bf16.mxu1 %v1615_v42 }
  0x7f   :  { %1236 = vmatpush3.bf16.msra.mxu0 %v1421_v43 }
  0x80   :  { %1237 = vmatprep.subr.bf16.mxu0 %v1423_v45  ;;  %v1460_v45 = vld [vmem:[#allocation10] sm:$0xff]  }
  0x81   :  { %1294 = vmatpush3.bf16.msra.mxu1 %v1422_v44  ;;  %v1459_v44 = vld [vmem:[#allocation8 + $0x38] sm:$0xff]  }
  0x82   :  { %1295 = vmatprep.subr.bf16.mxu1 %v1615_v42 }
  0x83   :  { %1238 = vmatpush3.bf16.msra.mxu0 %v1424_v46  ;;  %v1461_v46 = vld [vmem:[#allocation10 + $0x8] sm:$0xff]  }
  0x84   :  { %1239 = vmatprep.subr.bf16.mxu0 %v1426_v48  ;;  %v1463_v48 = vld [vmem:[#allocation10 + $0x18] sm:$0xff]  }
  0x85   :  { %1296 = vmatpush3.bf16.msra.mxu1 %v1425_v47  ;;  %v1462_v47 = vld [vmem:[#allocation10 + $0x10] sm:$0xff]  }
  0x86   :  { %1297 = vmatprep.subr.bf16.mxu1 %v1615_v42 }
  0x87   :  { %1240 = vmatpush3.bf16.msra.mxu0 %v1427_v49  ;;  %v1464_v49 = vld [vmem:[#allocation10 + $0x20] sm:$0xff]  }
  0x88   :  { %1241 = vmatprep.subr.bf16.mxu0 %v1429_v50  ;;  %v1465_v50 = vld [vmem:[#allocation10 + $0x28] sm:$0xff]  }
  0x89   :  { %1298 = vmatpush3.bf16.msra.mxu1 %v1428_v51  ;;  %v1466_v51 = vld [vmem:[#allocation10 + $0x30] sm:$0xff]  }
  0x8a   :  { %1299 = vmatprep.subr.bf16.mxu1 %v1615_v42 }
  0x8b   :  { %1242 = vmatpush3.bf16.msra.mxu0 %v1430_v52  ;;  %v1162_v52 = vld [vmem:[%s1808_s4] ss:$0 sm:$0xff] }
  0x8c   :  { %1243 = vmatprep.subr.bf16.mxu0 %v1432_v53 }
  0x8d   :  { %1300 = vmatpush3.bf16.msra.mxu1 %v1431_v54 }
  0x8e   :  { %1301 = vmatprep.subr.bf16.mxu1 %v1615_v42 }
  0x8f   :  { %1244 = vmatpush3.bf16.msra.mxu0 %v1433_v55 }
  0x90   :  { %1245 = vmatprep.subr.bf16.mxu0 %v1435_v56 }
  0x91   :  { %1302 = vmatpush3.bf16.msra.mxu1 %v1434_v57 }
  0x92   :  { %1303 = vmatprep.subr.bf16.mxu1 %v1615_v42 }
  0x93   :  { %1246 = vmatpush3.bf16.msra.mxu0 %v1436_v58 }
  0x94   :  { %1247 = vmatprep.subr.bf16.mxu0 %v1438_v62 }
  0x95   :  { %1304 = vmatpush3.bf16.msra.mxu1 %v1437_v60  ;;  %v1171_v60 = vld [vmem:[%s1810_s6] ss:$0 sm:$0xff]  ;;  %s1578_s6 = scalar_lea.vmem %s1088_s12, 128 }
  0x96   :  { %1305 = vmatprep.subr.bf16.mxu1 %v1615_v42  ;;  %p1579_p12 = scmp.ne.s32.totalorder %s1088_s12, %s1578_s6  ;;  %p1584_p0 = scmp.lt.s32.totalorder %s1578_s6, %s1578_s6 }
  0x97   :  { %1248 = vmatpush3.bf16.msra.mxu0 %v1439_v63 }
  0x98   :  { %1311 = vmatprep.subr.bf16.mxu0 %v1615_v42  ;;  %p1585_p1 = por %p1584_p0, %p1583_p13 }
  0x99   :  { %1306 = vmatpush3.bf16.msra.mxu1 %v1442_v0 }
  0x9a   :  { %697 = vmatmul.mubr.bf16.vlgmr.msra.gmra.mrb[4].mxu0 %v1103_v1  ;;  %1331 = vmatprep.subr.bf16.mxu1 %v1615_v42  ;;  %p1586_p2 = pnand %p1585_p1, %p1579_p12 }
  0x9b   :  { %1327 = vmatprep.mubr.msk.bf16.mxu0 %vm1616_vm0, %v1615_v42  ;;  %1312 = vmatpush3.bf16.msra.mxu0 %v1444_v3 }
  0x9c   :  { %1308 = vmatmul.mubr.bf16.vlgmr.msra.gmra.mrb[4].mxu1 %v1443_v2  ;;  %1313 = vmatprep.subr.bf16.mxu0 %v1615_v42  ;;  %v1180_v2 = vld [vmem:[%s1812_s8] ss:$0 sm:$0xff] }
  0x9d   :  { %1347 = vmatprep.mubr.msk.bf16.mxu1 %vm1616_vm0, %v1615_v42  ;;  %1332 = vmatpush3.bf16.msra.mxu1 %v1452_v11 }
  0x9e   :  { %1333 = vmatprep.subr.bf16.mxu1 %v1615_v42 }
  0x9f   :  { %1314 = vmatpush3.bf16.msra.mxu0 %v1445_v4 }
  0xa0   :  { %1315 = vmatprep.subr.bf16.mxu0 %v1615_v42 }
  0xa1   :  { %1334 = vmatpush3.bf16.msra.mxu1 %v1453_v12 }
  0xa2   :  { %1335 = vmatprep.subr.bf16.mxu1 %v1615_v42 }
  0xa3   :  { %1316 = vmatpush3.bf16.msra.mxu0 %v1446_v5 }
  0xa4   :  { %1317 = vmatprep.subr.bf16.mxu0 %v1615_v42 }
  0xa5   :  { %1336 = vmatpush3.bf16.msra.mxu1 %v1454_v13 }
  0xa6   :  { %1337 = vmatprep.subr.bf16.mxu1 %v1615_v42 }
  0xa7   :  { %1318 = vmatpush3.bf16.msra.mxu0 %v1447_v6 }
  0xa8   :  { %1319 = vmatprep.subr.bf16.mxu0 %v1615_v42 }
  0xa9   :  { %1338 = vmatpush3.bf16.msra.mxu1 %v1455_v14 }
  0xaa   :  { %1339 = vmatprep.subr.bf16.mxu1 %v1615_v42 }
  0xab   :  { %1320 = vmatpush3.bf16.msra.mxu0 %v1448_v7 }
  0xac   :  { %1321 = vmatprep.subr.bf16.mxu0 %v1615_v42 }
  0xad   :  { %1340 = vmatpush3.bf16.msra.mxu1 %v1456_v15 }
  0xae   :  { %1341 = vmatprep.subr.bf16.mxu1 %v1615_v42 }
  0xaf   :  { %1322 = vmatpush3.bf16.msra.mxu0 %v1449_v8 }
  0xb0   :  { %1323 = vmatprep.subr.bf16.mxu0 %v1615_v42 }
  0xb1   :  { %1342 = vmatpush3.bf16.msra.mxu1 %v1457_v16 }
  0xb2   :  { %1343 = vmatprep.subr.bf16.mxu1 %v1615_v42 }
  0xb3   :  { %1324 = vmatpush3.bf16.msra.mxu0 %v1450_v9 }
  0xb4   :  { %1325 = vmatprep.subr.bf16.mxu0 %v1615_v42 }
  0xb5   :  { %1344 = vmatpush3.bf16.msra.mxu1 %v1458_v17 }
  0xb6   :  { %1345 = vmatprep.subr.bf16.mxu1 %v1615_v42 }
  0xb7   :  { %1326 = vmatpush3.bf16.msra.mxu0 %v1451_v10 }
  0xb8   :  { %1351 = vmatprep.subr.bf16.mxu0 %v1615_v42 }
  0xb9   :  { %1346 = vmatpush3.bf16.msra.mxu1 %v1459_v44 }
 0x14d   :  { %v1205_v18 = vpop.f32.mrb[0].mxu0 }
 0x14e   :  { %v1206_v20 = vpop.f32.mrb[1].mxu0 }
 0x14f   :  { %v1207_v21 = vadd.f32 %v1206_v20, %v1205_v18  ;;  %v1208_v22 = vpop.f32.mrb[2].mxu0  ;;  %v1227_v23 = vpop.f32.mrb[0].mxu1 }
 0x150   :  { %v1209_v24 = vpop.f32.mrb[3].mxu0  ;;  %v1228_v25 = vpop.f32.mrb[1].mxu1 }
 0x151   :  { %v619_v26 = vadd.f32 %v1207_v21, %v1098_v19  ;;  %v1229_v27 = vadd.f32 %v1228_v25, %v1227_v23  ;;  %v1230_v28 = vpop.f32.mrb[2].mxu1 }
 0x152   :  { %v1231_v29 = vpop.f32.mrb[3].mxu1 }
 0x153   :  { %v659_v30 = vadd.f32 %v1229_v27, %v619_v26 }
 0x16d   :  { %v1249_v31 = vpop.f32.mrb[4].mxu0 }
 0x16e   :  { %v1250_v32 = vpop.f32.mrb[5].mxu0 }
 0x16f   :  { %v1251_v33 = vadd.f32 %v1250_v32, %v1249_v31  ;;  %v1252_v34 = vpop.f32.mrb[6].mxu0  ;;  %v738_v35 = vpop.f32.mrb[4].mxu1 }
 0x170   :  { %v1253_v36 = vpop.f32.mrb[7].mxu0  ;;  %v1309_v37 = vpop.f32.mrb[5].mxu1 }
 0x171   :  { %v699_v38 = vadd.f32 %v1251_v33, %v659_v30  ;;  %v741_v39 = vpop.f32.mrb[6].mxu1 }
 0x172   :  { %v1310_v40 = vpop.f32.mrb[7].mxu1 }
 0x173   :  { %v739_v41 = vadd.f32 %v738_v35, %v699_v38 }
 0x175   :  { %v744_v43 = vpack.c.bf16 %v739_v41, %v739_v41 }
 0x177   :  { %1328 = vmatmul.mubr.bf16.vlgmr.msra.gmra.mrb[8].mxu0 %v744_v43 }
 0x178   :  { %1367 = vmatprep.mubr.msk.bf16.mxu0 %vm1616_vm0, %v1615_v42  ;;  %1352 = vmatpush3.bf16.msra.mxu0 %v1460_v45 }
 0x179   :  { %1353 = vmatprep.subr.bf16.mxu0 %v1615_v42 }
 0x17c   :  { %1354 = vmatpush3.bf16.msra.mxu0 %v1461_v46 }
 0x17d   :  { %1355 = vmatprep.subr.bf16.mxu0 %v1615_v42 }
 0x180   :  { %1356 = vmatpush3.bf16.msra.mxu0 %v1462_v47 }
 0x181   :  { %1357 = vmatprep.subr.bf16.mxu0 %v1615_v42 }
 0x184   :  { %1358 = vmatpush3.bf16.msra.mxu0 %v1463_v48 }
 0x185   :  { %1359 = vmatprep.subr.bf16.mxu0 %v1615_v42 }
 0x188   :  { %1360 = vmatpush3.bf16.msra.mxu0 %v1464_v49 }
 0x189   :  { %1361 = vmatprep.subr.bf16.mxu0 %v1615_v42 }
 0x18c   :  { %1362 = vmatpush3.bf16.msra.mxu0 %v1465_v50 }
 0x18d   :  { %1363 = vmatprep.subr.bf16.mxu0 %v1615_v42 }
 0x190   :  { %1364 = vmatpush3.bf16.msra.mxu0 %v1466_v51 }
 0x191   :  { %1365 = vmatprep.subr.bf16.mxu0 %v1615_v42 }
 0x194   :  { %1366 = vmatpush3.bf16.msra.mxu0 %v1467_v59 }
 0x24a   :  { %v850_v53 = vpop.f32.mrb[8].mxu0 }
 0x24b   :  { %v851_v54 = vadd.f32 %v1162_v52, %v850_v53  ;;  %v1329_v55 = vpop.f32.mrb[9].mxu0 }
 0x24c   :  { %v853_v56 = vpop.f32.mrb[10].mxu0 }
 0x24d   :  { %v856_v57 = vpack.c.bf16 %v851_v54, %v851_v54  ;;  %v1330_v58 = vpop.f32.mrb[11].mxu0 }
 0x24f   :  { %1348 = vmatmul.mubr.bf16.vlgmr.msra.gmra.mrb[8].mxu1 %v856_v57 }
 0x322   :  { %v962_v61 = vpop.f32.mrb[8].mxu1 }
 0x323   :  { %v963_v62 = vadd.f32 %v1171_v60, %v962_v61  ;;  %v1349_v42 = vpop.f32.mrb[9].mxu1 }
 0x324   :  { %v965_v63 = vpop.f32.mrb[10].mxu1 }
 0x325   :  { %v968_v0 = vpack.c.bf16 %v963_v62, %v963_v62  ;;  %v1350_v1 = vpop.f32.mrb[11].mxu1 }
 0x327   :  { %1368 = vmatmul.mubr.bf16.vlgmr.msra.gmra.mrb[12].mxu0 %v968_v0 }
 0x3fa   :  { %v1074_v3 = vpop.f32.mrb[12].mxu0 }
 0x3fb   :  { %v1075_v4 = vadd.f32 %v1180_v2, %v1074_v3  ;;  %v1369_v5 = vpop.f32.mrb[13].mxu0 }
 0x3fc   :  { %v1077_v6 = vpop.f32.mrb[14].mxu0 }
 0x3fd   :  { %1080 = vst [vmem:[#allocation11] sm:$0xff] %v1075_v4  ;;  %v1370_v7 = vpop.f32.mrb[15].mxu0 }
 0x3fe   :  { %1589 = shalt.err (!%p1586_p2)
}
 0x3ff   :  { %s1590_s8 = scalar_lea.hbm %s1813_s9, 128 }
 0x400   :  { %p1591_p3 = scmp.ne.s32.totalorder %s1813_s9, %s1590_s8  ;;  %p1594_p4 = scmp.lt.u32.totalorder %s1590_s8, %s1813_s9 }
 0x402   :  { %p1596_p5 = pnand %p1594_p4, %p1591_p3 }
 0x404   :  { %1599 = shalt.err (!%p1596_p5)
}
 0x405   :  { %1090 = dma.vmem_to_hbm [thread:$0]  %s1088_s12, 128, %s1813_s9, [#allocation4]  }
 0x406   :  { %1606 = dma.done.wait [#allocation4], 128  }
 0x407   :  { %1607 = vsyncadd [#allocation4], 4294967168 }
 0x408   :  { %1094 = vsyncpa [#allocation3], 1 }
 0x409   :  { %1095 = vsyncpa [#allocation6], 1 }
 0x40a   :  { %1096 = vsyncpa [#allocation9], 1 }
 0x40b   :  { %1097 = vsyncpa [#allocation4], 1 }

</bundles_post_ra>
